<compile_context>
chip_gen: v7x
topology: tpu7x:2x2x1
jax: 0.10.0
libtpu: 0.0.40
codegen_flags: <defaults>
</compile_context>

<pallas_src>
import functools

import jax
import jax.numpy as jnp
from jax import lax
from jax.experimental import pallas as pl
from jax.experimental.pallas import tpu as pltpu


# Raise v5e's 16 MiB scoped-VMEM default; stays well under v7x's 64 MiB physical VMEM.
_VMEM_LIMIT_BYTES = 32 * 1024 * 1024


def _keep_mask(shape, keep_prob):
    """Bernoulli keep-mask scaled by 1/keep_prob. Call pltpu.prng_seed() once per block first.

    Uses a raw-uint32 threshold compare (no shift/float-convert) per the perf review.
    Only traced when training dropout is enabled.
    """
    bits = pltpu.bitcast(pltpu.prng_random_bits(shape), jnp.uint32)
    thresh = jnp.uint32(int(keep_prob * 4294967296.0) & 0xFFFFFFFF)
    return (bits < thresh).astype(jnp.float32) * (1.0 / keep_prob)


def _attn_block_kernel(x_ref, wq_ref, bq_ref, wk_ref, bk_ref, wv_ref, bv_ref,
                       wo_ref, bo_ref, g_ref, beta_ref, out_ref, *,
                       num_heads, eps, dropout_p, training, seed):
    """One batch element per grid step: QKV proj -> MHA -> out proj -> (+res) -> LayerNorm."""
    f32 = jnp.float32
    x = x_ref[0].astype(f32)                       # (T, E)
    t, e = x.shape
    dh = e // num_heads
    scaling = float(dh) ** -0.5

    apply_dropout = training and dropout_p > 0.0
    if apply_dropout:
        # Seed once per grid step (per block), not per row.
        pltpu.prng_seed(seed + pl.program_id(0))

    q = jnp.dot(x, wq_ref[...].astype(f32), preferred_element_type=f32) + bq_ref[...].astype(f32)
    k = jnp.dot(x, wk_ref[...].astype(f32), preferred_element_type=f32) + bk_ref[...].astype(f32)
    v = jnp.dot(x, wv_ref[...].astype(f32), preferred_element_type=f32) + bv_ref[...].astype(f32)
    q = q * scaling                                 # fairseq scales q after the bias add

    wo = wo_ref[...].astype(f32)                    # (E, E), already (in, out)
    attn = jnp.zeros((t, e), f32)
    for h in range(num_heads):                      # static loop over heads
        sl = slice(h * dh, (h + 1) * dh)
        qh, kh, vh = q[:, sl], k[:, sl], v[:, sl]   # (T, Dh)
        s = jnp.dot(qh, kh.T, preferred_element_type=f32)        # (T, T)
        s = s - jnp.max(s, axis=-1, keepdims=True)
        p = jnp.exp(s)
        p = p / jnp.sum(p, axis=-1, keepdims=True)
        # TODO(synk): attention_dropout on p is not applied (eval-mode semantics).
        ctx = jnp.dot(p, vh, preferred_element_type=f32)          # (T, Dh)
        # Fold the output projection into per-head accumulation (avoids concat).
        attn = attn + jnp.dot(ctx, wo[sl, :], preferred_element_type=f32)
    attn = attn + bo_ref[...].astype(f32)

    if apply_dropout:
        attn = attn * _keep_mask(attn.shape, 1.0 - dropout_p)

    y = x + attn                                    # residual
    mean = jnp.mean(y, axis=-1, keepdims=True)
    var = jnp.mean(jnp.square(y - mean), axis=-1, keepdims=True)
    y = (y - mean) * lax.rsqrt(var + eps)
    y = y * g_ref[...].astype(f32) + beta_ref[...].astype(f32)

    out_ref[0] = y.astype(out_ref.dtype)


def _ffn_block_kernel(x_ref, w1_ref, b1_ref, w2_ref, b2_ref, g_ref, beta_ref, out_ref, *,
                      eps, dropout_p, act_dropout_p, training, seed):
    """TM token rows per grid step: fc1 -> relu -> fc2 -> (+res) -> LayerNorm."""
    f32 = jnp.float32
    x = x_ref[...].astype(f32)                      # (TM, E)

    apply_dropout = training and (dropout_p > 0.0 or act_dropout_p > 0.0)
    if apply_dropout:
        pltpu.prng_seed(seed + 7919 + pl.program_id(0))

    h = jnp.dot(x, w1_ref[...].astype(f32), preferred_element_type=f32) + b1_ref[...].astype(f32)
    h = jnp.maximum(h, 0.0)                         # activation_fn = relu
    if training and act_dropout_p > 0.0:
        h = h * _keep_mask(h.shape, 1.0 - act_dropout_p)

    y = jnp.dot(h, w2_ref[...].astype(f32), preferred_element_type=f32) + b2_ref[...].astype(f32)
    if training and dropout_p > 0.0:
        y = y * _keep_mask(y.shape, 1.0 - dropout_p)

    y = x + y                                       # residual
    mean = jnp.mean(y, axis=-1, keepdims=True)
    var = jnp.mean(jnp.square(y - mean), axis=-1, keepdims=True)
    y = (y - mean) * lax.rsqrt(var + eps)
    y = y * g_ref[...].astype(f32) + beta_ref[...].astype(f32)

    out_ref[...] = y.astype(out_ref.dtype)


def transformer_sentence_encoder_layer_forward(
        x, params, *, num_heads, dropout_p=0.1, activation_dropout_p=0.1,
        self_attn_mask=None, self_attn_padding_mask=None,
        eps=1e-5, training=False, seed=0):
    """x: (T, B, E) fairseq layout. params holds torch-convention (out, in) weights.

    Returns (y, attn) with attn=None (need_weights=False in the reference forward).
    """
    assert self_attn_mask is None and self_attn_padding_mask is None  # TODO(synk): masks
    T, B, E = x.shape
    H = num_heads
    assert E % H == 0
    Fdim = params["fc1_w"].shape[0]

    # Transpose torch (out, in) weights once so kernels compute x @ W.
    wq_t = params["q_w"].T
    wk_t = params["k_w"].T
    wv_t = params["v_w"].T
    wo_t = params["out_w"].T
    w1_t = params["fc1_w"].T                        # (E, F)
    w2_t = params["fc2_w"].T                        # (F, E)
    bq = params["q_b"].reshape(1, E)
    bk = params["k_b"].reshape(1, E)
    bv = params["v_b"].reshape(1, E)
    bo = params["out_b"].reshape(1, E)
    b1 = params["fc1_b"].reshape(1, Fdim)
    b2 = params["fc2_b"].reshape(1, E)
    g1 = params["ln1_g"].reshape(1, E)
    be1 = params["ln1_b"].reshape(1, E)
    g2 = params["ln2_g"].reshape(1, E)
    be2 = params["ln2_b"].reshape(1, E)

    x_bte = jnp.transpose(x, (1, 0, 2))             # (B, T, E)

    # ---------------- Attention + first residual/LayerNorm ----------------
    attn_kernel = functools.partial(
        _attn_block_kernel, num_heads=H, eps=eps,
        dropout_p=float(dropout_p), training=training, seed=int(seed))

    w_spec = pl.BlockSpec((E, E), lambda b: (0, 0))        # VMEM-resident weights
    v_spec = pl.BlockSpec((1, E), lambda b: (0, 0))        # VMEM-resident biases / LN params

    y1 = pl.pallas_call(
        attn_kernel,
        out_shape=jax.ShapeDtypeStruct((B, T, E), x.dtype),
        grid_spec=pltpu.PrefetchScalarGridSpec(
            num_scalar_prefetch=0,
            grid=(B,),
            in_specs=[
                pl.BlockSpec((1, T, E), lambda b: (b, 0, 0)),     # x block (full sequence)
                w_spec, v_spec,                                   # q proj
                w_spec, v_spec,                                   # k proj
                w_spec, v_spec,                                   # v proj
                w_spec, v_spec,                                   # out proj
                v_spec, v_spec,                                   # self_attn_layer_norm g/b
            ],
            out_specs=pl.BlockSpec((1, T, E), lambda b: (b, 0, 0)),
        ),
        compiler_params=pltpu.CompilerParams(
            dimension_semantics=("parallel",),
            vmem_limit_bytes=_VMEM_LIMIT_BYTES),
    )(x_bte, wq_t, bq, wk_t, bk, wv_t, bv, wo_t, bo, g1, be1)

    # ---------------- FFN + second residual/LayerNorm ----------------
    # Flatten tokens and process TM rows per grid step (lane-dense (TM, E) blocks).
    N = B * T
    rows = y1.reshape(N, E)
    TM = 256 if N >= 256 else N
    Np = TM * ((N + TM - 1) // TM)
    if Np != N:
        rows = jnp.pad(rows, ((0, Np - N), (0, 0)))

    ffn_kernel = functools.partial(
        _ffn_block_kernel, eps=eps, dropout_p=float(dropout_p),
        act_dropout_p=float(activation_dropout_p), training=training, seed=int(seed))

    y2 = pl.pallas_call(
        ffn_kernel,
        out_shape=jax.ShapeDtypeStruct((Np, E), x.dtype),
        grid_spec=pltpu.PrefetchScalarGridSpec(
            num_scalar_prefetch=0,
            grid=(Np // TM,),
            in_specs=[
                pl.BlockSpec((TM, E), lambda i: (i, 0)),          # token rows
                pl.BlockSpec((E, Fdim), lambda i: (0, 0)),        # fc1 weight (resident)
                pl.BlockSpec((1, Fdim), lambda i: (0, 0)),        # fc1 bias
                pl.BlockSpec((Fdim, E), lambda i: (0, 0)),        # fc2 weight (resident)
                pl.BlockSpec((1, E), lambda i: (0, 0)),           # fc2 bias
                pl.BlockSpec((1, E), lambda i: (0, 0)),           # final_layer_norm gamma
                pl.BlockSpec((1, E), lambda i: (0, 0)),           # final_layer_norm beta
            ],
            out_specs=pl.BlockSpec((TM, E), lambda i: (i, 0)),
        ),
        compiler_params=pltpu.CompilerParams(
            dimension_semantics=("parallel",),
            vmem_limit_bytes=_VMEM_LIMIT_BYTES),
    )(rows, w1_t, b1, w2_t, b2, g2, be2)

    y = y2[:N].reshape(B, T, E).transpose(1, 0, 2)  # back to (T, B, E)
    return y, None


if __name__ == "__main__":
    # Small shapes consistent with the module (seq=8, batch=2, embed=32, ffn=64, heads=4).
    T, B = 8, 2
    E, FFN, H = 32, 64, 4

    key = jax.random.PRNGKey(0)
    ks = jax.random.split(key, 14)

    def w(k, out_dim, in_dim, scale=0.05):
        return jax.random.normal(k, (out_dim, in_dim), jnp.float32) * scale

    def b(k, dim, scale=0.01):
        return jax.random.normal(k, (dim,), jnp.float32) * scale

    params = {
        "q_w": w(ks[0], E, E),   "q_b": b(ks[1], E),
        "k_w": w(ks[2], E, E),   "k_b": b(ks[3], E),
        "v_w": w(ks[4], E, E),   "v_b": b(ks[5], E),
        "out_w": w(ks[6], E, E), "out_b": b(ks[7], E),
        "ln1_g": jnp.ones((E,), jnp.float32), "ln1_b": jnp.zeros((E,), jnp.float32),
        "fc1_w": w(ks[8], FFN, E),  "fc1_b": b(ks[9], FFN),
        "fc2_w": w(ks[10], E, FFN), "fc2_b": b(ks[11], E),
        "ln2_g": jnp.ones((E,), jnp.float32), "ln2_b": jnp.zeros((E,), jnp.float32),
    }
    x = jax.random.normal(ks[13], (T, B, E), jnp.float32)

    y, attn = transformer_sentence_encoder_layer_forward(
        x, params, num_heads=H,
        dropout_p=0.1, activation_dropout_p=0.1,
        training=False,   # eval-mode forward: dropout = identity (deterministic)
        seed=1234)
    y = jax.block_until_ready(y)

    assert y.shape == (T, B, E)
    assert y.dtype == jnp.float32
    assert bool(jnp.all(jnp.isfinite(y)))
    assert attn is None
    print("KERNEL_OK")
</pallas_src>

<mosaic_0001>
module attributes {stable_mosaic.version = 11 : i64} {
  func.func @_attn_block_kernel(%arg0: i32, %arg1: memref<1x8x32xf32, #tpu.memory_space<vmem>>, %arg2: memref<32x32xf32, #tpu.memory_space<vmem>>, %arg3: memref<1x32xf32, #tpu.memory_space<vmem>>, %arg4: memref<32x32xf32, #tpu.memory_space<vmem>>, %arg5: memref<1x32xf32, #tpu.memory_space<vmem>>, %arg6: memref<32x32xf32, #tpu.memory_space<vmem>>, %arg7: memref<1x32xf32, #tpu.memory_space<vmem>>, %arg8: memref<32x32xf32, #tpu.memory_space<vmem>>, %arg9: memref<1x32xf32, #tpu.memory_space<vmem>>, %arg10: memref<1x32xf32, #tpu.memory_space<vmem>>, %arg11: memref<1x32xf32, #tpu.memory_space<vmem>>, %arg12: memref<1x8x32xf32, #tpu.memory_space<vmem>>) attributes {dimension_semantics = [#tpu.dimension_semantics<parallel>], iteration_bounds = array<i64: 2>, scalar_prefetch = 0 : i64, scratch_operands = 0 : i64, tpu.core_type = #tpu.core_type<tc>, window_params = [{transform_indices = @transform_0, window_bounds = array<i64: 1, 8, 32>}, {pipeline_mode = #tpu.pipeline_mode<synchronous>, transform_indices = @transform_1, window_bounds = array<i64: 32, 32>}, {pipeline_mode = #tpu.pipeline_mode<synchronous>, transform_indices = @transform_2, window_bounds = array<i64: 1, 32>}, {pipeline_mode = #tpu.pipeline_mode<synchronous>, transform_indices = @transform_3, window_bounds = array<i64: 32, 32>}, {pipeline_mode = #tpu.pipeline_mode<synchronous>, transform_indices = @transform_4, window_bounds = array<i64: 1, 32>}, {pipeline_mode = #tpu.pipeline_mode<synchronous>, transform_indices = @transform_5, window_bounds = array<i64: 32, 32>}, {pipeline_mode = #tpu.pipeline_mode<synchronous>, transform_indices = @transform_6, window_bounds = array<i64: 1, 32>}, {pipeline_mode = #tpu.pipeline_mode<synchronous>, transform_indices = @transform_7, window_bounds = array<i64: 32, 32>}, {pipeline_mode = #tpu.pipeline_mode<synchronous>, transform_indices = @transform_8, window_bounds = array<i64: 1, 32>}, {pipeline_mode = #tpu.pipeline_mode<synchronous>, transform_indices = @transform_9, window_bounds = array<i64: 1, 32>}, {pipeline_mode = #tpu.pipeline_mode<synchronous>, transform_indices = @transform_10, window_bounds = array<i64: 1, 32>}, {transform_indices = @transform_11, window_bounds = array<i64: 1, 8, 32>}]} {
    %c0 = arith.constant 0 : index
    %c0_0 = arith.constant 0 : index
    %c0_1 = arith.constant 0 : index
    %0 = vector.load %arg1[%c0, %c0_0, %c0_1] : memref<1x8x32xf32, #tpu.memory_space<vmem>>, vector<1x8x32xf32>
    %1 = vector.shape_cast %0 : vector<1x8x32xf32> to vector<8x32xf32>
    %c0_2 = arith.constant 0 : index
    %c0_3 = arith.constant 0 : index
    %2 = vector.load %arg2[%c0_2, %c0_3] : memref<32x32xf32, #tpu.memory_space<vmem>>, vector<32x32xf32>
    %cst = arith.constant dense<0.000000e+00> : vector<8x32xf32>
    %3 = tpu.matmul %1, %2, %cst {dimension_numbers = #tpu.dot_dimension_numbers<[1], [0], [0], [1], [0, 0, 1, 1], [], []>} : vector<8x32xf32>, vector<32x32xf32>, vector<8x32xf32> -> vector<8x32xf32>
    %c0_4 = arith.constant 0 : index
    %c0_5 = arith.constant 0 : index
    %4 = vector.load %arg3[%c0_4, %c0_5] : memref<1x32xf32, #tpu.memory_space<vmem>>, vector<1x32xf32>
    %5 = vector.broadcast %4 : vector<1x32xf32> to vector<8x32xf32>
    %6 = arith.addf %3, %5 : vector<8x32xf32>
    %c0_6 = arith.constant 0 : index
    %c0_7 = arith.constant 0 : index
    %7 = vector.load %arg4[%c0_6, %c0_7] : memref<32x32xf32, #tpu.memory_space<vmem>>, vector<32x32xf32>
    %cst_8 = arith.constant dense<0.000000e+00> : vector<8x32xf32>
    %8 = tpu.matmul %1, %7, %cst_8 {dimension_numbers = #tpu.dot_dimension_numbers<[1], [0], [0], [1], [0, 0, 1, 1], [], []>} : vector<8x32xf32>, vector<32x32xf32>, vector<8x32xf32> -> vector<8x32xf32>
    %c0_9 = arith.constant 0 : index
    %c0_10 = arith.constant 0 : index
    %9 = vector.load %arg5[%c0_9, %c0_10] : memref<1x32xf32, #tpu.memory_space<vmem>>, vector<1x32xf32>
    %10 = vector.broadcast %9 : vector<1x32xf32> to vector<8x32xf32>
    %11 = arith.addf %8, %10 : vector<8x32xf32>
    %c0_11 = arith.constant 0 : index
    %c0_12 = arith.constant 0 : index
    %12 = vector.load %arg6[%c0_11, %c0_12] : memref<32x32xf32, #tpu.memory_space<vmem>>, vector<32x32xf32>
    %cst_13 = arith.constant dense<0.000000e+00> : vector<8x32xf32>
    %13 = tpu.matmul %1, %12, %cst_13 {dimension_numbers = #tpu.dot_dimension_numbers<[1], [0], [0], [1], [0, 0, 1, 1], [], []>} : vector<8x32xf32>, vector<32x32xf32>, vector<8x32xf32> -> vector<8x32xf32>
    %c0_14 = arith.constant 0 : index
    %c0_15 = arith.constant 0 : index
    %14 = vector.load %arg7[%c0_14, %c0_15] : memref<1x32xf32, #tpu.memory_space<vmem>>, vector<1x32xf32>
    %15 = vector.broadcast %14 : vector<1x32xf32> to vector<8x32xf32>
    %16 = arith.addf %13, %15 : vector<8x32xf32>
    %cst_16 = arith.constant 0.353553385 : f32
    %17 = vector.broadcast %cst_16 : f32 to vector<8x32xf32>
    %18 = arith.mulf %6, %17 : vector<8x32xf32>
    %c0_17 = arith.constant 0 : index
    %c0_18 = arith.constant 0 : index
    %19 = vector.load %arg8[%c0_17, %c0_18] : memref<32x32xf32, #tpu.memory_space<vmem>>, vector<32x32xf32>
    %cst_19 = arith.constant 0.000000e+00 : f32
    %20 = vector.broadcast %cst_19 : f32 to vector<8x32xf32>
    %21 = vector.extract_strided_slice %18 {offsets = [0, 0], sizes = [8, 8], strides = [1, 1]} : vector<8x32xf32> to vector<8x8xf32>
    %22 = vector.extract_strided_slice %11 {offsets = [0, 0], sizes = [8, 8], strides = [1, 1]} : vector<8x32xf32> to vector<8x8xf32>
    %23 = vector.extract_strided_slice %16 {offsets = [0, 0], sizes = [8, 8], strides = [1, 1]} : vector<8x32xf32> to vector<8x8xf32>
    %24 = tpu.transpose %22, [1, 0] : vector<8x8xf32> -> vector<8x8xf32>
    %cst_20 = arith.constant dense<0.000000e+00> : vector<8x8xf32>
    %25 = tpu.matmul %21, %24, %cst_20 {dimension_numbers = #tpu.dot_dimension_numbers<[1], [0], [0], [1], [0, 0, 1, 1], [], []>} : vector<8x8xf32>, vector<8x8xf32>, vector<8x8xf32> -> vector<8x8xf32>
    %cst_21 = arith.constant dense<0xFF800000> : vector<8xf32>
    %26 = vector.multi_reduction <maximumf>, %25, %cst_21 [1] : vector<8x8xf32> to vector<8xf32>
    %27 = vector.shape_cast %26 : vector<8xf32> to vector<8x1xf32>
    %28 = vector.broadcast %27 : vector<8x1xf32> to vector<8x8xf32>
    %29 = arith.subf %25, %28 : vector<8x8xf32>
    %30 = math.exp %29 : vector<8x8xf32>
    %cst_22 = arith.constant dense<0.000000e+00> : vector<8xf32>
    %31 = vector.multi_reduction <add>, %30, %cst_22 [1] : vector<8x8xf32> to vector<8xf32>
    %32 = vector.shape_cast %31 : vector<8xf32> to vector<8x1xf32>
    %33 = vector.broadcast %32 : vector<8x1xf32> to vector<8x8xf32>
    %34 = arith.divf %30, %33 : vector<8x8xf32>
    %cst_23 = arith.constant dense<0.000000e+00> : vector<8x8xf32>
    %35 = tpu.matmul %34, %23, %cst_23 {dimension_numbers = #tpu.dot_dimension_numbers<[1], [0], [0], [1], [0, 0, 1, 1], [], []>} : vector<8x8xf32>, vector<8x8xf32>, vector<8x8xf32> -> vector<8x8xf32>
    %36 = vector.extract_strided_slice %19 {offsets = [0, 0], sizes = [8, 32], strides = [1, 1]} : vector<32x32xf32> to vector<8x32xf32>
    %cst_24 = arith.constant dense<0.000000e+00> : vector<8x32xf32>
    %37 = tpu.matmul %35, %36, %cst_24 {dimension_numbers = #tpu.dot_dimension_numbers<[1], [0], [0], [1], [0, 0, 1, 1], [], []>} : vector<8x8xf32>, vector<8x32xf32>, vector<8x32xf32> -> vector<8x32xf32>
    %38 = arith.addf %20, %37 : vector<8x32xf32>
    %39 = vector.extract_strided_slice %18 {offsets = [0, 8], sizes = [8, 8], strides = [1, 1]} : vector<8x32xf32> to vector<8x8xf32>
    %40 = vector.extract_strided_slice %11 {offsets = [0, 8], sizes = [8, 8], strides = [1, 1]} : vector<8x32xf32> to vector<8x8xf32>
    %41 = vector.extract_strided_slice %16 {offsets = [0, 8], sizes = [8, 8], strides = [1, 1]} : vector<8x32xf32> to vector<8x8xf32>
    %42 = tpu.transpose %40, [1, 0] : vector<8x8xf32> -> vector<8x8xf32>
    %cst_25 = arith.constant dense<0.000000e+00> : vector<8x8xf32>
    %43 = tpu.matmul %39, %42, %cst_25 {dimension_numbers = #tpu.dot_dimension_numbers<[1], [0], [0], [1], [0, 0, 1, 1], [], []>} : vector<8x8xf32>, vector<8x8xf32>, vector<8x8xf32> -> vector<8x8xf32>
    %cst_26 = arith.constant dense<0xFF800000> : vector<8xf32>
    %44 = vector.multi_reduction <maximumf>, %43, %cst_26 [1] : vector<8x8xf32> to vector<8xf32>
    %45 = vector.shape_cast %44 : vector<8xf32> to vector<8x1xf32>
    %46 = vector.broadcast %45 : vector<8x1xf32> to vector<8x8xf32>
    %47 = arith.subf %43, %46 : vector<8x8xf32>
    %48 = math.exp %47 : vector<8x8xf32>
    %cst_27 = arith.constant dense<0.000000e+00> : vector<8xf32>
    %49 = vector.multi_reduction <add>, %48, %cst_27 [1] : vector<8x8xf32> to vector<8xf32>
    %50 = vector.shape_cast %49 : vector<8xf32> to vector<8x1xf32>
    %51 = vector.broadcast %50 : vector<8x1xf32> to vector<8x8xf32>
    %52 = arith.divf %48, %51 : vector<8x8xf32>
    %cst_28 = arith.constant dense<0.000000e+00> : vector<8x8xf32>
    %53 = tpu.matmul %52, %41, %cst_28 {dimension_numbers = #tpu.dot_dimension_numbers<[1], [0], [0], [1], [0, 0, 1, 1], [], []>} : vector<8x8xf32>, vector<8x8xf32>, vector<8x8xf32> -> vector<8x8xf32>
    %54 = vector.extract_strided_slice %19 {offsets = [8, 0], sizes = [8, 32], strides = [1, 1]} : vector<32x32xf32> to vector<8x32xf32>
    %cst_29 = arith.constant dense<0.000000e+00> : vector<8x32xf32>
    %55 = tpu.matmul %53, %54, %cst_29 {dimension_numbers = #tpu.dot_dimension_numbers<[1], [0], [0], [1], [0, 0, 1, 1], [], []>} : vector<8x8xf32>, vector<8x32xf32>, vector<8x32xf32> -> vector<8x32xf32>
    %56 = arith.addf %38, %55 : vector<8x32xf32>
    %57 = vector.extract_strided_slice %18 {offsets = [0, 16], sizes = [8, 8], strides = [1, 1]} : vector<8x32xf32> to vector<8x8xf32>
    %58 = vector.extract_strided_slice %11 {offsets = [0, 16], sizes = [8, 8], strides = [1, 1]} : vector<8x32xf32> to vector<8x8xf32>
    %59 = vector.extract_strided_slice %16 {offsets = [0, 16], sizes = [8, 8], strides = [1, 1]} : vector<8x32xf32> to vector<8x8xf32>
    %60 = tpu.transpose %58, [1, 0] : vector<8x8xf32> -> vector<8x8xf32>
    %cst_30 = arith.constant dense<0.000000e+00> : vector<8x8xf32>
    %61 = tpu.matmul %57, %60, %cst_30 {dimension_numbers = #tpu.dot_dimension_numbers<[1], [0], [0], [1], [0, 0, 1, 1], [], []>} : vector<8x8xf32>, vector<8x8xf32>, vector<8x8xf32> -> vector<8x8xf32>
    %cst_31 = arith.constant dense<0xFF800000> : vector<8xf32>
    %62 = vector.multi_reduction <maximumf>, %61, %cst_31 [1] : vector<8x8xf32> to vector<8xf32>
    %63 = vector.shape_cast %62 : vector<8xf32> to vector<8x1xf32>
    %64 = vector.broadcast %63 : vector<8x1xf32> to vector<8x8xf32>
    %65 = arith.subf %61, %64 : vector<8x8xf32>
    %66 = math.exp %65 : vector<8x8xf32>
    %cst_32 = arith.constant dense<0.000000e+00> : vector<8xf32>
    %67 = vector.multi_reduction <add>, %66, %cst_32 [1] : vector<8x8xf32> to vector<8xf32>
    %68 = vector.shape_cast %67 : vector<8xf32> to vector<8x1xf32>
    %69 = vector.broadcast %68 : vector<8x1xf32> to vector<8x8xf32>
    %70 = arith.divf %66, %69 : vector<8x8xf32>
    %cst_33 = arith.constant dense<0.000000e+00> : vector<8x8xf32>
    %71 = tpu.matmul %70, %59, %cst_33 {dimension_numbers = #tpu.dot_dimension_numbers<[1], [0], [0], [1], [0, 0, 1, 1], [], []>} : vector<8x8xf32>, vector<8x8xf32>, vector<8x8xf32> -> vector<8x8xf32>
    %72 = vector.extract_strided_slice %19 {offsets = [16, 0], sizes = [8, 32], strides = [1, 1]} : vector<32x32xf32> to vector<8x32xf32>
    %cst_34 = arith.constant dense<0.000000e+00> : vector<8x32xf32>
    %73 = tpu.matmul %71, %72, %cst_34 {dimension_numbers = #tpu.dot_dimension_numbers<[1], [0], [0], [1], [0, 0, 1, 1], [], []>} : vector<8x8xf32>, vector<8x32xf32>, vector<8x32xf32> -> vector<8x32xf32>
    %74 = arith.addf %56, %73 : vector<8x32xf32>
    %75 = vector.extract_strided_slice %18 {offsets = [0, 24], sizes = [8, 8], strides = [1, 1]} : vector<8x32xf32> to vector<8x8xf32>
    %76 = vector.extract_strided_slice %11 {offsets = [0, 24], sizes = [8, 8], strides = [1, 1]} : vector<8x32xf32> to vector<8x8xf32>
    %77 = vector.extract_strided_slice %16 {offsets = [0, 24], sizes = [8, 8], strides = [1, 1]} : vector<8x32xf32> to vector<8x8xf32>
    %78 = tpu.transpose %76, [1, 0] : vector<8x8xf32> -> vector<8x8xf32>
    %cst_35 = arith.constant dense<0.000000e+00> : vector<8x8xf32>
    %79 = tpu.matmul %75, %78, %cst_35 {dimension_numbers = #tpu.dot_dimension_numbers<[1], [0], [0], [1], [0, 0, 1, 1], [], []>} : vector<8x8xf32>, vector<8x8xf32>, vector<8x8xf32> -> vector<8x8xf32>
    %cst_36 = arith.constant dense<0xFF800000> : vector<8xf32>
    %80 = vector.multi_reduction <maximumf>, %79, %cst_36 [1] : vector<8x8xf32> to vector<8xf32>
    %81 = vector.shape_cast %80 : vector<8xf32> to vector<8x1xf32>
    %82 = vector.broadcast %81 : vector<8x1xf32> to vector<8x8xf32>
    %83 = arith.subf %79, %82 : vector<8x8xf32>
    %84 = math.exp %83 : vector<8x8xf32>
    %cst_37 = arith.constant dense<0.000000e+00> : vector<8xf32>
    %85 = vector.multi_reduction <add>, %84, %cst_37 [1] : vector<8x8xf32> to vector<8xf32>
    %86 = vector.shape_cast %85 : vector<8xf32> to vector<8x1xf32>
    %87 = vector.broadcast %86 : vector<8x1xf32> to vector<8x8xf32>
    %88 = arith.divf %84, %87 : vector<8x8xf32>
    %cst_38 = arith.constant dense<0.000000e+00> : vector<8x8xf32>
    %89 = tpu.matmul %88, %77, %cst_38 {dimension_numbers = #tpu.dot_dimension_numbers<[1], [0], [0], [1], [0, 0, 1, 1], [], []>} : vector<8x8xf32>, vector<8x8xf32>, vector<8x8xf32> -> vector<8x8xf32>
    %90 = vector.extract_strided_slice %19 {offsets = [24, 0], sizes = [8, 32], strides = [1, 1]} : vector<32x32xf32> to vector<8x32xf32>
    %cst_39 = arith.constant dense<0.000000e+00> : vector<8x32xf32>
    %91 = tpu.matmul %89, %90, %cst_39 {dimension_numbers = #tpu.dot_dimension_numbers<[1], [0], [0], [1], [0, 0, 1, 1], [], []>} : vector<8x8xf32>, vector<8x32xf32>, vector<8x32xf32> -> vector<8x32xf32>
    %92 = arith.addf %74, %91 : vector<8x32xf32>
    %c0_40 = arith.constant 0 : index
    %c0_41 = arith.constant 0 : index
    %93 = vector.load %arg9[%c0_40, %c0_41] : memref<1x32xf32, #tpu.memory_space<vmem>>, vector<1x32xf32>
    %94 = vector.broadcast %93 : vector<1x32xf32> to vector<8x32xf32>
    %95 = arith.addf %92, %94 : vector<8x32xf32>
    %96 = arith.addf %1, %95 : vector<8x32xf32>
    %cst_42 = arith.constant dense<0.000000e+00> : vector<8xf32>
    %97 = vector.multi_reduction <add>, %96, %cst_42 [1] : vector<8x32xf32> to vector<8xf32>
    %98 = vector.shape_cast %97 : vector<8xf32> to vector<8x1xf32>
    %cst_43 = arith.constant 3.200000e+01 : f32
    %99 = vector.broadcast %cst_43 : f32 to vector<8x1xf32>
    %100 = arith.divf %98, %99 : vector<8x1xf32>
    %101 = vector.broadcast %100 : vector<8x1xf32> to vector<8x32xf32>
    %102 = arith.subf %96, %101 : vector<8x32xf32>
    %103 = arith.mulf %102, %102 : vector<8x32xf32>
    %cst_44 = arith.constant dense<0.000000e+00> : vector<8xf32>
    %104 = vector.multi_reduction <add>, %103, %cst_44 [1] : vector<8x32xf32> to vector<8xf32>
    %105 = vector.shape_cast %104 : vector<8xf32> to vector<8x1xf32>
    %cst_45 = arith.constant 3.200000e+01 : f32
    %106 = vector.broadcast %cst_45 : f32 to vector<8x1xf32>
    %107 = arith.divf %105, %106 : vector<8x1xf32>
    %108 = vector.broadcast %100 : vector<8x1xf32> to vector<8x32xf32>
    %109 = arith.subf %96, %108 : vector<8x32xf32>
    %cst_46 = arith.constant 9.99999974E-6 : f32
    %110 = vector.broadcast %cst_46 : f32 to vector<8x1xf32>
    %111 = arith.addf %107, %110 : vector<8x1xf32>
    %112 = math.rsqrt %111 : vector<8x1xf32>
    %113 = vector.broadcast %112 : vector<8x1xf32> to vector<8x32xf32>
    %114 = arith.mulf %109, %113 : vector<8x32xf32>
    %c0_47 = arith.constant 0 : index
    %c0_48 = arith.constant 0 : index
    %115 = vector.load %arg10[%c0_47, %c0_48] : memref<1x32xf32, #tpu.memory_space<vmem>>, vector<1x32xf32>
    %116 = vector.broadcast %115 : vector<1x32xf32> to vector<8x32xf32>
    %117 = arith.mulf %114, %116 : vector<8x32xf32>
    %c0_49 = arith.constant 0 : index
    %c0_50 = arith.constant 0 : index
    %118 = vector.load %arg11[%c0_49, %c0_50] : memref<1x32xf32, #tpu.memory_space<vmem>>, vector<1x32xf32>
    %119 = vector.broadcast %118 : vector<1x32xf32> to vector<8x32xf32>
    %120 = arith.addf %117, %119 : vector<8x32xf32>
    %c0_51 = arith.constant 0 : index
    %c0_52 = arith.constant 0 : index
    %c0_53 = arith.constant 0 : index
    %121 = vector.load %arg12[%c0_51, %c0_52, %c0_53] : memref<1x8x32xf32, #tpu.memory_space<vmem>>, vector<1x8x32xf32>
    %122 = vector.shape_cast %121 : vector<1x8x32xf32> to vector<8x32xf32>
    %123 = vector.shape_cast %120 : vector<8x32xf32> to vector<1x8x32xf32>
    tpu.vector_store %arg12[%c0_51, %c0_52, %c0_53], %123 {strides = array<i32>} : memref<1x8x32xf32, #tpu.memory_space<vmem>>, vector<1x8x32xf32>,
    return
  }
  func.func @transform_0(%arg0: i32) -> (i32, i32, i32) {
    %c0_i32 = arith.constant 0 : i32
    %c0_i32_0 = arith.constant 0 : i32
    %c0_i32_1 = arith.constant 0 : i32
    return %arg0, %c0_i32, %c0_i32_0 : i32, i32, i32
  }
  func.func @transform_1(%arg0: i32) -> (i32, i32) {
    %c0_i32 = arith.constant 0 : i32
    %c0_i32_0 = arith.constant 0 : i32
    %c0_i32_1 = arith.constant 0 : i32
    return %c0_i32, %c0_i32_0 : i32, i32
  }
  func.func @transform_2(%arg0: i32) -> (i32, i32) {
    %c0_i32 = arith.constant 0 : i32
    %c0_i32_0 = arith.constant 0 : i32
    %c0_i32_1 = arith.constant 0 : i32
    return %c0_i32, %c0_i32_0 : i32, i32
  }
  func.func @transform_3(%arg0: i32) -> (i32, i32) {
    %c0_i32 = arith.constant 0 : i32
    %c0_i32_0 = arith.constant 0 : i32
    %c0_i32_1 = arith.constant 0 : i32
    return %c0_i32, %c0_i32_0 : i32, i32
  }
  func.func @transform_4(%arg0: i32) -> (i32, i32) {
    %c0_i32 = arith.constant 0 : i32
    %c0_i32_0 = arith.constant 0 : i32
    %c0_i32_1 = arith.constant 0 : i32
    return %c0_i32, %c0_i32_0 : i32, i32
  }
  func.func @transform_5(%arg0: i32) -> (i32, i32) {
    %c0_i32 = arith.constant 0 : i32
    %c0_i32_0 = arith.constant 0 : i32
    %c0_i32_1 = arith.constant 0 : i32
    return %c0_i32, %c0_i32_0 : i32, i32
  }
  func.func @transform_6(%arg0: i32) -> (i32, i32) {
    %c0_i32 = arith.constant 0 : i32
    %c0_i32_0 = arith.constant 0 : i32
    %c0_i32_1 = arith.constant 0 : i32
    return %c0_i32, %c0_i32_0 : i32, i32
  }
  func.func @transform_7(%arg0: i32) -> (i32, i32) {
    %c0_i32 = arith.constant 0 : i32
    %c0_i32_0 = arith.constant 0 : i32
    %c0_i32_1 = arith.constant 0 : i32
    return %c0_i32, %c0_i32_0 : i32, i32
  }
  func.func @transform_8(%arg0: i32) -> (i32, i32) {
    %c0_i32 = arith.constant 0 : i32
    %c0_i32_0 = arith.constant 0 : i32
    %c0_i32_1 = arith.constant 0 : i32
    return %c0_i32, %c0_i32_0 : i32, i32
  }
  func.func @transform_9(%arg0: i32) -> (i32, i32) {
    %c0_i32 = arith.constant 0 : i32
    %c0_i32_0 = arith.constant 0 : i32
    %c0_i32_1 = arith.constant 0 : i32
    return %c0_i32, %c0_i32_0 : i32, i32
  }
  func.func @transform_10(%arg0: i32) -> (i32, i32) {
    %c0_i32 = arith.constant 0 : i32
    %c0_i32_0 = arith.constant 0 : i32
    %c0_i32_1 = arith.constant 0 : i32
    return %c0_i32, %c0_i32_0 : i32, i32
  }
  func.func @transform_11(%arg0: i32) -> (i32, i32, i32) {
    %c0_i32 = arith.constant 0 : i32
    %c0_i32_0 = arith.constant 0 : i32
    %c0_i32_1 = arith.constant 0 : i32
    return %arg0, %c0_i32, %c0_i32_0 : i32, i32, i32
  }
}

</mosaic_0001>

<bundles_post_ra>
// kernel: tpu_custom_call.1
= control target key start
LH: loop header
LB: loop body
LE: loop exit
PB: predicated region body
PF: predicated region fallthrough
CT: control target
= control target key end

     0   :  { %s2839_s0 = inlined_call_operand.hbm [shape: f32[2,8,32], index: 0, kind: input, shape index: {}]   ;;  %s2840_s1 = inlined_call_operand.hbm [shape: f32[32,32], index: 1, kind: input, shape index: {}]   ;;  %s2841_s2 = inlined_call_operand.vmem [shape: f32[1,32], index: 2, kind: input, shape index: {}]   ;;  %s2842_s3 = inlined_call_operand.hbm [shape: f32[32,32], index: 3, kind: input, shape index: {}]   ;;  %s2843_s4 = inlined_call_operand.vmem [shape: f32[1,32], index: 4, kind: input, shape index: {}]   ;;  %s2844_s5 = inlined_call_operand.hbm [shape: f32[32,32], index: 5, kind: input, shape index: {}]   ;;  %s2845_s6 = inlined_call_operand.vmem [shape: f32[1,32], index: 6, kind: input, shape index: {}]   ;;  %s2846_s7 = inlined_call_operand.hbm [shape: f32[32,32], index: 7, kind: input, shape index: {}]   ;;  %s2847_s8 = inlined_call_operand.vmem [shape: f32[1,32], index: 8, kind: input, shape index: {}]   ;;  %s2848_s9 = inlined_call_operand.vmem [shape: f32[1,32], index: 9, kind: input, shape index: {}]   ;;  %s2849_s10 = inlined_call_operand.vmem [shape: f32[1,32], index: 10, kind: input, shape index: {}]   ;;  %s2850_s11 = inlined_call_operand.hbm [shape: f32[2,8,32], index: 11, kind: output, shape index: {}]  }
   0x1   :  { %2855 = sst [smem:[#allocation16_spill]] %s2839_s0 }
   0x2   :  { %2856 = sst [smem:[#allocation17_spill]] %s2840_s1 }
   0x3   :  { %2857 = sst [smem:[#allocation18_spill]] %s2848_s9 }
   0x4   :  { %2858 = sst [smem:[#allocation19_spill]] %s2849_s10 }
   0x5   :  { %2859 = sst [smem:[#allocation20_spill]] %s2850_s11 }
   0x6   :  { %16 = vsyncpa [#allocation3], 0 }
   0x7   :  { %18 = vsyncpa [#allocation3 + $0x1], 0 }
   0x8   :  { %19 = vsyncpa [#allocation6], 0 }
   0x9   :  { %20 = vsyncpa [#allocation9], 0 }
   0xa   :  { %21 = vsyncpa [#allocation4], 0 }
   0xb   :  { %23 = vsyncpa [#allocation4 + $0x1], 0  ;;  %s2426_s17 = smov 0   ;;  %s2428_s18 = smov 0  }
   0xc   :  { %s2430_s19 = smov 0   ;;  %s2432_s20 = smov 0  }
   0xd LB: > { %s2352_s21 = smov [#allocation5]   ;;  %s2447_s23 = sadd.s32 4294967295, %s2350_s20   ;;  %s2350_s20 = sphi %s2432_s20, %s2885_s20   ;;  %s2346_s19 = sphi %s2430_s19, %s2884_s19   ;;  %s2342_s18 = sphi %s2428_s18, %s2883_s18   ;;  %s2338_s17 = sphi %s2426_s17, %s2882_s17  }
   0xe   : > { %s308_s22 = sshll.u32 %s2352_s21, 4  ;;  %p1827_p0 = scmp.ge.s32.totalorder %s2350_s20, 1  ;;  %s2452_s22 = int_to_ptr.vmem [resolvable:$true] %s308_s22 }
   0xf   : > { %p2852_p1 = scmp.eq.s32.totalorder %s2447_s23, 0  ;;  %p296_p2 = scmp.lt.s32.totalorder %s2350_s20, 3 }
  0x10   : > { %s2353_s25 = smov [#allocation8]   ;;  %s2354_s28 = smov [#allocation7]  }
  0x11   : > { %p2454_p3 = pnand %p1827_p0, %p296_p2  ;;  %s340_s26 = sshll.u32 %s2353_s25, 4  ;;  %s2467_s26 = int_to_ptr.vmem [resolvable:$true] %s340_s26 }
  0x12   : > { %s324_s29 = sshll.u32 %s2354_s28, 4  ;;  %s2862_s1 = sld [smem:[#allocation17_spill]]  ;;  %s2469_s29 = int_to_ptr.vmem [resolvable:$true] %s324_s29 }
  0x13   : > { %s2860_s24 = scalar_select %p2454_p3, 1, 0 }
  0x14   : > { %p2041_p5 = pneg %p2454_p3 }
  0x16   : > { %p2463_p6 = pnand %p2041_p5, %p2852_p1 }
  0x18   : > { %s2134_s13 = scalar_lea.hbm %s2862_s1, 512  ;;  %p2479_p8 = pneg %p2463_p6 }
  0x19   : > { %p2135_p7 = scmp.ne.s32.totalorder %s2862_s1, %s2134_s13  ;;  %p2141_p11 = scmp.lt.u32.totalorder %s2134_s13, %s2862_s1 }
  0x1b   : > { %p2137_p9 = pnand %p2479_p8, %p2135_p7 }
  0x1d   : > { %p2138_p10 = pneg %p2137_p9 }
  0x1f   : > { %p2143_p12 = pnand %p2141_p11, %p2138_p10 }
  0x21   : > { %2146 = shalt.err (!%p2143_p12)
}
  0x22   : > { %s2147_s28 = scalar_lea.vmem %s2452_s22, 512  ;;  %p2155_p5 = scmp.lt.s32.totalorder %s2452_s22, %s2452_s22 }
  0x23   : > { %p2148_p13 = scmp.ne.s32.totalorder %s2452_s22, %s2147_s28  ;;  %p2156_p4 = scmp.lt.s32.totalorder %s2147_s28, %s2147_s28 }
  0x25   : > { %p2150_p0 = pnand %p2148_p13, %p2479_p8  ;;  %p2157_p7 = por %p2156_p4, %p2155_p5 }
  0x27   : > { %p2151_p2 = pneg %p2150_p0 }
  0x29   : > { %p2158_p9 = pnand %p2157_p7, %p2151_p2 }
  0x2b   : > { %2161 = shalt.err (!%p2158_p9)
}
  0x2c   : > { %s2355_s30 = smov 128   ;;  %s2356_s12 = smov 8  }
  0x2d   : > { %2044 = dma.hbm_to_vmem [thread:$0]  (!%p2463_p6), %s2862_s1, 512, %s2452_s22, [#allocation6], %s2355_s30, %s2355_s30, %s2356_s12  }
  0x2e   : > { %s2162_s25 = scalar_lea.hbm %s2844_s5, 512 }
  0x2f   : > { %p2163_p4 = scmp.ne.s32.totalorder %s2844_s5, %s2162_s25  ;;  %p2169_p12 = scmp.lt.u32.totalorder %s2162_s25, %s2844_s5 }
  0x31   : > { %p2165_p10 = pnand %p2163_p4, %p2479_p8 }
  0x33   : > { %p2166_p11 = pneg %p2165_p10 }
  0x35   : > { %p2171_p13 = pnand %p2169_p12, %p2166_p11 }
  0x37   : > { %2174 = shalt.err (!%p2171_p13)
}
  0x38   : > { %s2175_s22 = scalar_lea.vmem %s2467_s26, 512  ;;  %p2183_p7 = scmp.lt.s32.totalorder %s2467_s26, %s2467_s26 }
  0x39   : > { %p2176_p0 = scmp.ne.s32.totalorder %s2467_s26, %s2175_s22  ;;  %p2184_p9 = scmp.lt.s32.totalorder %s2175_s22, %s2175_s22 }
  0x3b   : > { %p2178_p2 = pnand %p2176_p0, %p2479_p8  ;;  %p2185_p4 = por %p2184_p9, %p2183_p7 }
  0x3d   : > { %p2179_p5 = pneg %p2178_p2 }
  0x3f   : > { %p2186_p10 = pnand %p2185_p4, %p2179_p5 }
  0x41   : > { %2189 = shalt.err (!%p2186_p10)
}
  0x42   : > { %2050 = dma.hbm_to_vmem [thread:$0]  (!%p2463_p6), %s2844_s5, 512, %s2467_s26, [#allocation9], %s2355_s30, %s2355_s30, %s2356_s12  }
  0x43   : > { %s2190_s14 = scalar_lea.hbm %s2842_s3, 512 }
  0x44   : > { %p2191_p11 = scmp.ne.s32.totalorder %s2842_s3, %s2190_s14  ;;  %p2197_p0 = scmp.lt.u32.totalorder %s2190_s14, %s2842_s3 }
  0x46   : > { %p2193_p12 = pnand %p2191_p11, %p2479_p8 }
  0x48   : > { %p2194_p13 = pneg %p2193_p12 }
  0x4a   : > { %p2199_p2 = pnand %p2197_p0, %p2194_p13 }
  0x4c   : > { %2202 = shalt.err (!%p2199_p2)
}
  0x4d   : > { %s2203_s26 = scalar_lea.vmem %s2469_s29, 512  ;;  %p2211_p4 = scmp.lt.s32.totalorder %s2469_s29, %s2469_s29 }
  0x4e   : > { %p2204_p5 = scmp.ne.s32.totalorder %s2469_s29, %s2203_s26  ;;  %p2212_p10 = scmp.lt.s32.totalorder %s2203_s26, %s2203_s26 }
  0x50   : > { %p2206_p7 = pnand %p2204_p5, %p2479_p8  ;;  %p2213_p11 = por %p2212_p10, %p2211_p4 }
  0x52   : > { %p2207_p9 = pneg %p2206_p7 }
  0x54   : > { %p2214_p12 = pnand %p2213_p11, %p2207_p9 }
  0x56   : > { %2217 = shalt.err (!%p2214_p12)
}
  0x57   : > { %2047 = dma.hbm_to_vmem [thread:$0]  (!%p2463_p6), %s2842_s3, 512, %s2469_s29, [#allocation6], %s2355_s30, %s2355_s30, %s2356_s12  }
  0x58   : > { %s2357_s10 = smov [#allocation10]   ;;  %s2218_s15 = scalar_lea.hbm %s2846_s7, 512 }
  0x59   : > { %s356_s11 = sshll.u32 %s2357_s10, 4  ;;  %p2219_p13 = scmp.ne.s32.totalorder %s2846_s7, %s2218_s15  ;;  %s357_s11 = int_to_ptr.vmem [resolvable:$true] %s356_s11 }
  0x5a   : > { %p2225_p5 = scmp.lt.u32.totalorder %s2218_s15, %s2846_s7 }
  0x5b   : > { %p2221_p0 = pnand %p2219_p13, %p2479_p8 }
  0x5d   : > { %p2222_p2 = pneg %p2221_p0 }
  0x5f   : > { %p2227_p7 = pnand %p2225_p5, %p2222_p2 }
  0x61   : > { %2230 = shalt.err (!%p2227_p7)
}
  0x62   : > { %s2231_s29 = scalar_lea.vmem %s357_s11, 512  ;;  %p2239_p11 = scmp.lt.s32.totalorder %s357_s11, %s357_s11 }
  0x63   : > { %p2232_p9 = scmp.ne.s32.totalorder %s357_s11, %s2231_s29  ;;  %p2240_p12 = scmp.lt.s32.totalorder %s2231_s29, %s2231_s29 }
  0x65   : > { %p2234_p4 = pnand %p2232_p9, %p2479_p8  ;;  %p2241_p1 = por %p2240_p12, %p2239_p11 }
  0x67   : > { %p2235_p10 = pneg %p2234_p4 }
  0x69   : > { %p2242_p3 = pnand %p2241_p1, %p2235_p10 }
  0x6b   : > { %2245 = shalt.err (!%p2242_p3)
}
  0x6c   : > { %2053 = dma.hbm_to_vmem [thread:$0]  (!%p2463_p6), %s2846_s7, 512, %s357_s11, [#allocation9], %s2355_s30, %s2355_s30, %s2356_s12  }
  0x6d   : > { %s1826_s27 = sadd.s32 4294967294, %s2350_s20   ;;  %s2578_s16 = sadd.s32 1, %s2350_s20  }
  0x6e   : > { %s33_s10 = ssub.s32 %s2350_s20, %s2578_s16  ;;  %s36_s13 = sadd.s32 1, %s2346_s19 }
  0x6f   : > { %p34_p1 = scmp.eq.s32.totalorder %s33_s10, 0  ;;  %p43_p3 = scmp.ne.s32.totalorder %s2346_s19, %s2342_s18 }
  0x70   : > { %p44_p8 = scmp.eq.s32.totalorder %s2350_s20, 0  ;;  %p49_p13 = scmp.ne.s32.totalorder %s2342_s18, %s2338_s17 }
  0x71   : > { %s2589_s14 = scalar_select %p34_p1, %s2346_s19, %s36_s13  }
  0x72   : > { %p2591_p0 = por %p44_p8, %p43_p3  ;;  %p2865_p2 = scmp.eq.s32.totalorder %s2447_s23, 0 }
  0x73   : > { %p283_p5 = scmp.eq.s32.totalorder %s2447_s23, 1  ;;  %p289_p7 = scmp.eq.s32.totalorder %s1826_s27, 1 }
  0x74   : > { %p2597_p6 = por %p2865_p2, %p49_p13  ;;  %p2066_p9 = scmp.lt.s32.totalorder %s2350_s20, 2 }
  0x75   : > { %s379_s12 = sand.u32 1, %s2346_s19   ;;  %p2604_p4 = por %p283_p5, %p43_p3 }
  0x76   : > { %p2608_p10 = por %p289_p7, %p49_p13  ;;  %s1833_s25 = sshll.u32 %s379_s12, 3 }
  0x77   : > { %s2867_s11 = scalar_select %p2604_p4, 1, 0 }
  0x78   : > { %s2868_s21 = scalar_select %p2608_p10, 1, 0 }
  0x79   : > { %s1834_s28 = sshll.u32 %s2350_s20, 7  ;;  %s2869_s0 = sld [smem:[#allocation16_spill]] }
  0x7a   : > { %s383_s9 = scalar_lea.vmem [#allocation2], %s1833_s25  ;;  %p2622_p11 = pnand %p2066_p9, %p2591_p0 }
  0x7b   : > { %s390_s27 = sshll.u32 %s383_s9, 4  ;;  %s380_s13 = scalar_lea.sflag [#allocation3], %s379_s12  ;;  %s2618_s27 = int_to_ptr.vmem [resolvable:$true] %s390_s27 }
  0x7c   : > { %p2248_p1 = pneg %p2622_p11 }
  0x7f   : > { %s2616_s22 = scalar_lea.hbm %s2869_s0, %s1834_s28  ;;  %s2251_s26 = scalar_lea.hbm %s2869_s0, 256 }
  0x80   : > { %s2246_s1 = scalar_lea.hbm %s2616_s22, 128  ;;  %p2252_p13 = scmp.lt.u32.totalorder %s2616_s22, %s2869_s0 }
  0x81   : > { %p2247_p12 = scmp.ne.s32.totalorder %s2616_s22, %s2246_s1  ;;  %p2253_p0 = scmp.lt.u32.totalorder %s2251_s26, %s2246_s1 }
  0x82   : > { %p2255_p5 = scmp.lt.u32.totalorder %s2246_s1, %s2616_s22 }
  0x83   : > { %p2249_p3 = pnand %p2248_p1, %p2247_p12  ;;  %p2254_p2 = por %p2253_p0, %p2252_p13 }
  0x85   : > { %p2250_p8 = pneg %p2249_p3  ;;  %p2256_p7 = por %p2255_p5, %p2254_p2 }
  0x87   : > { %p2257_p9 = pnand %p2256_p7, %p2250_p8 }
  0x89   : > { %2260 = shalt.err (!%p2257_p9)
}
  0x8a   : > { %s2261_s12 = scalar_lea.vmem %s2618_s27, 128  ;;  %s2358_s9 = smov [#allocation2]  }
  0x8b   : > { %p2262_p12 = scmp.ne.s32.totalorder %s2618_s27, %s2261_s12  ;;  %s2266_s25 = sshll.u32 %s2358_s9, 4  ;;  %s2267_s25 = int_to_ptr.vmem [resolvable:$false] %s2266_s25 }
  0x8c   : > { %s2268_s28 = scalar_lea.vmem %s2267_s25, 256  ;;  %p2269_p4 = scmp.lt.s32.totalorder %s2618_s27, %s2267_s25 }
  0x8d   : > { %p2264_p3 = pnand %p2262_p12, %p2248_p1  ;;  %p2270_p13 = scmp.lt.s32.totalorder %s2268_s28, %s2261_s12 }
  0x8f   : > { %p2265_p10 = pneg %p2264_p3  ;;  %p2271_p0 = por %p2270_p13, %p2269_p4 }
  0x91   : > { %p2272_p2 = pnand %p2271_p0, %p2265_p10 }
  0x93   : > { %2275 = shalt.err (!%p2272_p2)
}
  0x94   : > { %2057 = dma.hbm_to_vmem [thread:$0]  (!%p2622_p11), %s2616_s22, 128, %s2618_s27, %s380_s13  }
  0x95   : > { %p2871_p8 = scmp.ne.s32.totalorder %s2860_s24, 0 }
  0x96   : > { %s2654_s1 = sand.u32 (!%p2871_p8), 1, %s2342_s18  }
  0x97   : > { %399 = sbr.rel (%p2871_p8) target bundleno = 3063 (0xbf7), region = 64  ;;  %s1836_s26 = sshll.u32 (!%p2871_p8), %s2654_s1, 3 }
  0x98   : > { %s402_s15 = scalar_lea.sflag (!%p2871_p8), [#allocation3], %s2654_s1  ;;  %s2660_s29 = scalar_lea.vmem (!%p2871_p8), [#allocation2], %s1836_s26 }
  0x9e   : > { %2321 = dma.done.wait (%p2597_p6), %s402_s15, 128  }
  0x9f   : > { %2323 = vsyncadd (%p2597_p6), %s402_s15, 4294967168  ;;  %p2872_p4 = scmp.eq.s32.totalorder %s2447_s23, 0 }
  0xa1   : > { %2325 = dma.done.wait (%p2872_p4), [#allocation6], 1024   ;;  %p2873_p10 = pmov %p2872_p4 }
  0xa2   : > { %p2874_p11 = pmov %p2872_p4 }
  0xa3   : > { %2327 = vsyncadd (%p2873_p10), [#allocation6], 4294966272 }
  0xa4   : > { %2329 = dma.done.wait (%p2874_p11), [#allocation9], 1024   ;;  %p2875_p1 = pmov %p2872_p4 }
  0xa5   : > { %v2359_v0 = vmov 0.0|0.0   ;;  %vm2360_vm0 = vmmov 0   ;;  %v2361_v1 = vmov 0.0   ;;  %v546_v2 = vld [vmem:[#allocation7] sm:$0xff]  ;;  %v547_v3 = vld [vmem:[#allocation7 + $0x8] sm:$0xff]  ;;  %v548_v7 = vld [vmem:[#allocation7 + $0x10] sm:$0xff] }
  0xa6   : > { %2331 = vsyncadd (%p2875_p1), [#allocation9], 4294966272  ;;  %2009 = vmatprep.subr.bf16.mxu1 %v2359_v0  ;;  %2003 = vmatprep.subr.bf16.mxu0 %v2359_v0  ;;  %v461_v4 = vld [vmem:[#allocation5] sm:$0xff]  ;;  %v2010_v5 = vpack.c.bf16 %v547_v3, %v546_v2  ;;  %v462_v6 = vld [vmem:[#allocation5 + $0x8] sm:$0xff]  ;;  %vm472_vm1 = vcmask 261120   ;;  %vm713_vm2 = vcmask 64512  }
  0xa7   : > { %1929 = vmatprep.mubr.msk.f32.mxu1 %vm2360_vm0, %v2361_v1  ;;  %1918 = vmatprep.mubr.msk.f32.mxu0 %vm2360_vm0, %v2361_v1  ;;  %v549_v8 = vld [vmem:[#allocation7 + $0x18] sm:$0xff]  ;;  %v2004_v9 = vpack.c.bf16 %v462_v6, %v461_v4  ;;  %v463_v10 = vld [vmem:[#allocation5 + $0x10] sm:$0xff]  ;;  %v627_v15 = vld [vmem:[#allocation8] sm:$0xff]  ;;  %s2362_s10 = smov 120   ;;  %s2363_s9 = smov 112  }
  0xa8   : > { %v464_v11 = vld [vmem:[#allocation5 + $0x18] sm:$0xff]  ;;  %2011 = vmatpush3.bf16.msra.mxu1 %v2010_v5  ;;  %v2013_v12 = vpack.c.bf16 %v549_v8, %v548_v7  ;;  %v628_v16 = vld [vmem:[#allocation8 + $0x8] sm:$0xff]  ;;  %v629_v17 = vld [vmem:[#allocation8 + $0x10] sm:$0xff]  ;;  %s2364_s25 = smov 104   ;;  %s2876_s30 = sld [smem:[#allocation18_spill]] }
  0xa9   : > { %2005 = vmatpush3.bf16.msra.mxu0 %v2004_v9  ;;  %2012 = vmatprep.subr.bf16.mxu1 %v2359_v0  ;;  %v2007_v13 = vpack.c.bf16 %v464_v11, %v463_v10  ;;  %v2679_v14 = vld [vmem:[%s2660_s29] sm:$0xff]  ;;  %v2016_v18 = vpack.c.bf16 %v628_v16, %v627_v15  ;;  %v710_v55 = vld [vmem:[#allocation10 + $0x8] sm:$0xff]  ;;  %v709_v60 = vld [vmem:[#allocation10] sm:$0xff]  ;;  %s1868_s13 = sshll.u32 %s2447_s23, 7  ;;  %s459_s12 = scalar_lea.vmem [#allocation11], %s1836_s26 }
  0xaa   : > { %2006 = vmatprep.subr.bf16.mxu0 %v2359_v0  ;;  %v630_v19 = vld [vmem:[#allocation8 + $0x18] sm:$0xff]  ;;  %v1844_v21 = vld [vmem:[%s2843_s4] ss:$0 sm:$0xff]  ;;  %s2878_s15 = sld [smem:[#allocation20_spill]]  ;;  %s1705_s29 = scalar_lea.sflag [#allocation4], %s2654_s1 }
  0xab   : > { %v2019_v20 = vpack.c.bf16 %v630_v19, %v629_v17  ;;  %v1842_v22 = vld [vmem:[%s2841_s2] ss:$0 sm:$0xff]  ;;  %p2879_p5 = scmp.ne.s32.totalorder %s2867_s11, 0  ;;  %s2365_s23 = smov [#allocation11]  }
  0xac   : > { %2014 = vmatpush3.bf16.msra.mxu1 %v2013_v12  ;;  %v1846_v30 = vld [vmem:[%s2845_s6] ss:$0 sm:$0xff]  ;;  %s2280_s26 = sshll.u32 %s2365_s23, 4  ;;  %s2281_s26 = int_to_ptr.vmem [resolvable:$false] %s2280_s26 }
  0xad   : > { %2008 = vmatpush3.bf16.msra.mxu0 %v2007_v13  ;;  %1943 = vmatprep.subr.mxu1 %v2361_v1 }
  0xae   : > { %2015 = vmatprep.subr.bf16.mxu0 %v2359_v0 }
  0xaf   : > { %1930 = vmatmul.mubr.msk.f32.vlgmr.msra.gmra.mrb[0].mxu1 %vm472_vm1, %v2679_v14 }
  0xb0   : > { %1919 = vmatmul.mubr.msk.f32.vlgmr.msra.gmra.mrb[0].mxu0 %vm472_vm1, %v2679_v14  ;;  %1945 = vmatprep.mubr.msk.f32.mxu1 %vm2360_vm0, %v2361_v1  ;;  %s2794_s0 = scalar_lea.hbm %s2878_s15, %s1868_s13 }
  0xb1   : > { %1940 = vmatprep.mubr.msk.f32.mxu0 %vm2360_vm0, %v2361_v1  ;;  %2017 = vmatpush3.bf16.msra.mxu0 %v2016_v18 }
  0xb2   : > { %2018 = vmatprep.subr.bf16.mxu0 %v2359_v0 }
  0xb5   : > { %2020 = vmatpush3.bf16.msra.mxu0 %v2019_v20 }
  0xb6   : > { %1953 = vmatprep.subr.mxu0 %v2361_v1 }
  0xb8   : > { %1941 = vmatmul.mubr.msk.f32.vlgmr.msra.gmra.mrb[2].mxu0 %vm472_vm1, %v2679_v14 }
  0xb9   : > { %1955 = vmatprep.mubr.msk.f32.mxu0 %vm2360_vm0, %v2361_v1 }
 0x182   : > { %v623_v23 = vpop.f32.mrb[0].mxu1 }
 0x183   : > { %v624_v24 = vadd.f32 %v1844_v21, %v623_v23  ;;  %v542_v25 = vpop.f32.mrb[0].mxu0  ;;  %v1931_v26 = vpop.f32.mrb[1].mxu1 }
 0x184   : > { %v543_v27 = vadd.f32 %v1842_v22, %v542_v25  ;;  %v1920_v28 = vpop.f32.mrb[1].mxu0 }
 0x185   : > { %876 = vrot.lane.b32.xlu0 %v624_v24, %s2362_s10  ;;  %1944 = vmatpush3.xpose.msk.msra.mxu1 %vm713_vm2, %v624_v24 }
 0x186   : > { %v2703_v29 = vmul.f32 0.35355338, %v543_v27  ;;  %1948 = vmatprep.subr.mxu1 %v2361_v1 }
 0x188   : > { %1946 = vmatmul.mubr.msk.f32.vlgmr.msra.gmra.mrb[2].mxu1 %vm713_vm2, %v2703_v29 }
 0x189   : > { %874 = vrot.lane.b32.xlu0 %v2703_v29, %s2362_s10  ;;  %1950 = vmatprep.mubr.msk.f32.mxu1 %vm2360_vm0, %v2361_v1 }
 0x18b   : > { %v704_v31 = vpop.f32.mrb[2].mxu0 }
 0x18c   : > { %v2715_v32 = vadd.f32 %v1846_v30, %v704_v31  ;;  %v1942_v33 = vpop.f32.mrb[3].mxu0 }
 0x18e   : > { %1949 = vmatpush3.msra.mxu1 %v2715_v32 }
 0x18f   : > { %1958 = vmatprep.subr.mxu1 %v2361_v1 }
 0x1f7   : > { %v877_v34 = vpop.permute.xlu0 %876 }
 0x1f8   : > { %1954 = vmatpush3.xpose.msk.msra.mxu0 %vm713_vm2, %v877_v34 }
 0x1f9   : > { %1963 = vmatprep.subr.mxu0 %v2361_v1 }
 0x1fb   : > { %v875_v35 = vpop.permute.xlu0 %874 }
 0x1fc   : > { %1956 = vmatmul.mubr.msk.f32.vlgmr.msra.gmra.mrb[4].mxu0 %vm713_vm2, %v875_v35 }
 0x1fd   : > { %1965 = vmatprep.mubr.msk.f32.mxu0 %vm2360_vm0, %v2361_v1  ;;  %1964 = vmatpush3.msra.mxu0 %v710_v55 }
 0x1fe   : > { %1973 = vmatprep.subr.mxu0 %v2361_v1 }
 0x25b   : > { %v786_v36 = vpop.f32.mrb[2].mxu1 }
 0x25c   : > { %v1947_v37 = vpop.f32.mrb[3].mxu1  ;;  %v790_v38 = vsel %vm713_vm2, %v786_v36, -inf }
 0x25d   : > { %791 = vmax.xlane.f32.xlu1 %v790_v38 }
 0x2cf   : > { %v948_v39 = vpop.f32.mrb[4].mxu0 }
 0x2d0   : > { %v1957_v40 = vpop.f32.mrb[5].mxu0  ;;  %v952_v41 = vsel %vm713_vm2, %v948_v39, -inf }
 0x2d1   : > { %953 = vmax.xlane.f32.xlu1 %v952_v41 }
 0x2ea   : > { %v792_v42 = vpop.xlane.xlu1 %791 }
 0x2eb   : > { %v793_v43 = vsub.f32 %v786_v36, %v792_v42  ;;  %v712_v36 = vld [vmem:[#allocation10 + $0x18] sm:$0xff] }
 0x2ed   : > { %v794_v44 = vmul.f32 1.442695, %v793_v43 }
 0x2ef   : > { %2116 = vpow2.f32 %v794_v44 }
 0x2f9   : > { %v2117_v45 = vpop.eup %2116 }
 0x2fa   : > { %v796_v46 = vsel %vm713_vm2, %v2117_v45, 0.0 }
 0x2fb   : > { %797 = vadd.xlane.f32.xlu0 %v796_v46 }
 0x311   : > { %1275 = vrot.lane.b32.xlu0 %v2715_v32, %s2363_s9 }
 0x315   : > { %1427 = vrot.lane.b32.xlu0 %v624_v24, %s2364_s25 }
 0x35e   : > { %v954_v47 = vpop.xlane.xlu1 %953 }
 0x35f   : > { %v955_v48 = vsub.f32 %v948_v39, %v954_v47 }
 0x361   : > { %v956_v49 = vmul.f32 1.442695, %v955_v48 }
 0x363   : > { %2118 = vpow2.f32 %v956_v49 }
 0x36d   : > { %v2119_v50 = vpop.eup %2118 }
 0x36e   : > { %v958_v51 = vsel %vm713_vm2, %v2119_v50, 0.0 }
 0x36f   : > { %959 = vadd.xlane.f32.xlu1 %v958_v51 }
 0x380   : > { %964 = vrot.lane.b32.xlu1 %v2715_v32, %s2362_s10  ;;  %s2877_s10 = sld [smem:[#allocation19_spill]] }
 0x384   : > { %1188 = vrot.lane.b32.xlu1 %v624_v24, %s2363_s9  ;;  %v711_v24 = vld [vmem:[#allocation10 + $0x10] sm:$0xff] }
 0x388   : > { %v798_v52 = vpop.xlane.xlu0 %797  ;;  %1186 = vrot.lane.b32.xlu1 %v2703_v29, %s2363_s9  ;;  %s1718_s9 = sshll.u32 %s459_s12, 4  ;;  %s2796_s9 = int_to_ptr.vmem [resolvable:$true] %s1718_s9 }
 0x389   : > { %2120 = vrcp.f32 %v798_v52  ;;  %s2276_s24 = scalar_lea.vmem %s2796_s9, 128  ;;  %p2283_p12 = scmp.lt.s32.totalorder %s2796_s9, %s2281_s26 }
 0x38a   : > { %p2277_p6 = scmp.ne.s32.totalorder %s2796_s9, %s2276_s24 }
 0x38c   : > { %v1276_v62 = vpop.permute.xlu0 %1275  ;;  %p2278_p7 = pnand %p2277_p6, %p2879_p5 }
 0x38e   : > { %p2279_p9 = pneg %p2278_p7 }
 0x390   : > { %v1428_v19 = vpop.permute.xlu0 %1427 }
 0x393   : > { %v2121_v53 = vpop.eup %2120 }
 0x394   : > { %v800_v54 = vmul.f32 %v2121_v53, %v2117_v45 }
 0x396   : > { %1951 = vmatmul.mubr.msk.f32.vlgmr.msra.gmra.mrb[4].mxu1 %vm713_vm2, %v800_v54 }
 0x397   : > { %1960 = vmatprep.mubr.msk.f32.mxu1 %vm2360_vm0, %v2361_v1 }
 0x3fc   : > { %v960_v56 = vpop.xlane.xlu1 %959 }
 0x3fd   : > { %2122 = vrcp.f32 %v960_v56 }
 0x400   : > { %v965_v57 = vpop.permute.xlu1 %964 }
 0x401   : > { %1959 = vmatpush3.msra.mxu1 %v965_v57 }
 0x402   : > { %1968 = vmatprep.subr.mxu1 %v2361_v1 }
 0x404   : > { %v1189_v0 = vpop.permute.xlu1 %1188 }
 0x407   : > { %v2123_v58 = vpop.eup %2122 }
 0x408   : > { %v962_v59 = vmul.f32 %v2123_v58, %v2119_v50  ;;  %v1187_v4 = vpop.permute.xlu1 %1186 }
 0x40a   : > { %1961 = vmatmul.mubr.msk.f32.vlgmr.msra.gmra.mrb[6].mxu1 %vm713_vm2, %v962_v59 }
 0x40b   : > { %1969 = vmatpush3.msra.mxu1 %v709_v60  ;;  %1970 = vmatprep.mubr.msk.f32.mxu1 %vm2360_vm0, %v2361_v1 }
 0x40c   : > { %1978 = vmatprep.subr.mxu1 %v2361_v1 }
 0x469   : > { %v870_v61 = vpop.f32.mrb[4].mxu1 }
 0x46a   : > { %v1952_v63 = vpop.f32.mrb[5].mxu1  ;;  %1971 = vmatmul.mubr.msk.f32.vlgmr.msra.gmra.mrb[8].mxu1 %vm713_vm2, %v870_v61  ;;  %v1866_v61 = vld [vmem:[%s2877_s10] ss:$0 sm:$0xff] }
 0x46b   : > { %1979 = vmatpush3.msra.mxu1 %v1276_v62  ;;  %1980 = vmatprep.mubr.msk.f32.mxu1 %vm2360_vm0, %v2361_v1 }
 0x46c   : > { %1988 = vmatprep.subr.mxu1 %v2361_v1 }
 0x4dd   : > { %v1036_v2 = vpop.f32.mrb[6].mxu1 }
 0x4de   : > { %v1962_v3 = vpop.f32.mrb[7].mxu1  ;;  %1966 = vmatmul.mubr.msk.f32.vlgmr.msra.gmra.mrb[6].mxu0 %vm713_vm2, %v1036_v2 }
 0x4df   : > { %1974 = vmatpush3.xpose.msk.msra.mxu0 %vm713_vm2, %v1189_v0  ;;  %1975 = vmatprep.mubr.msk.f32.mxu0 %vm2360_vm0, %v2361_v1 }
 0x4e0   : > { %1983 = vmatprep.subr.mxu0 %v2361_v1 }
 0x4e2   : > { %1976 = vmatmul.mubr.msk.f32.vlgmr.msra.gmra.mrb[8].mxu0 %vm713_vm2, %v1187_v4 }
 0x4e3   : > { %1985 = vmatprep.mubr.msk.f32.mxu0 %vm2360_vm0, %v2361_v1  ;;  %1984 = vmatpush3.msra.mxu0 %v711_v24 }
 0x4e4   : > { %1993 = vmatprep.subr.mxu0 %v2361_v1 }
 0x53d   : > { %v1182_v5 = vpop.f32.mrb[8].mxu1 }
 0x53e   : > { %v1972_v6 = vpop.f32.mrb[9].mxu1 }
 0x5b1   : > { %v1109_v7 = vpop.f32.mrb[6].mxu0 }
 0x5b2   : > { %v1183_v8 = vadd.f32 %v1182_v5, %v1109_v7  ;;  %v1967_v9 = vpop.f32.mrb[7].mxu0 }
 0x5b5   : > { %v1260_v10 = vpop.f32.mrb[8].mxu0 }
 0x5b6   : > { %v1977_v11 = vpop.f32.mrb[9].mxu0  ;;  %v1264_v12 = vsel %vm713_vm2, %v1260_v10, -inf }
 0x5b7   : > { %1265 = vmax.xlane.f32.xlu1 %v1264_v12 }
 0x644   : > { %v1266_v13 = vpop.xlane.xlu1 %1265 }
 0x645   : > { %v1267_v15 = vsub.f32 %v1260_v10, %v1266_v13 }
 0x647   : > { %v1268_v16 = vmul.f32 1.442695, %v1267_v15 }
 0x649   : > { %2124 = vpow2.f32 %v1268_v16 }
 0x653   : > { %v2125_v17 = vpop.eup %2124 }
 0x654   : > { %v1270_v18 = vsel %vm713_vm2, %v2125_v17, 0.0 }
 0x655   : > { %1271 = vadd.xlane.f32.xlu0 %v1270_v18 }
 0x66b   : > { %1425 = vrot.lane.b32.xlu0 %v2703_v29, %s2364_s25 }
 0x6e2   : > { %v1272_v20 = vpop.xlane.xlu0 %1271 }
 0x6e3   : > { %2126 = vrcp.f32 %v1272_v20 }
 0x6e6   : > { %v1426_v23 = vpop.permute.xlu0 %1425 }
 0x6ed   : > { %v2127_v21 = vpop.eup %2126 }
 0x6ee   : > { %v1274_v22 = vmul.f32 %v2127_v21, %v2125_v17 }
 0x6f0   : > { %1981 = vmatmul.mubr.msk.f32.vlgmr.msra.gmra.mrb[10].mxu1 %vm713_vm2, %v1274_v22 }
 0x6f1   : > { %1989 = vmatpush3.xpose.msk.msra.mxu1 %vm713_vm2, %v1428_v19  ;;  %1990 = vmatprep.mubr.msk.f32.mxu1 %vm2360_vm0, %v2361_v1 }
 0x6f2   : > { %1998 = vmatprep.subr.mxu1 %v2361_v1 }
 0x6f4   : > { %1991 = vmatmul.mubr.msk.f32.vlgmr.msra.gmra.mrb[12].mxu1 %vm713_vm2, %v1426_v23 }
 0x6f5   : > { %2000 = vmatprep.mubr.msk.f32.mxu1 %vm2360_vm0, %v2361_v1  ;;  %1999 = vmatpush3.msra.mxu1 %v712_v36 }
 0x7c3   : > { %v1347_v25 = vpop.f32.mrb[10].mxu1 }
 0x7c4   : > { %v1982_v26 = vpop.f32.mrb[11].mxu1  ;;  %1986 = vmatmul.mubr.msk.f32.vlgmr.msra.gmra.mrb[10].mxu0 %vm713_vm2, %v1347_v25 }
 0x7c5   : > { %1995 = vmatprep.mubr.msk.f32.mxu0 %vm2360_vm0, %v2361_v1 }
 0x7c7   : > { %v1499_v27 = vpop.f32.mrb[12].mxu1 }
 0x7c8   : > { %v1992_v28 = vpop.f32.mrb[13].mxu1  ;;  %v1503_v29 = vsel %vm713_vm2, %v1499_v27, -inf }
 0x7c9   : > { %1504 = vmax.xlane.f32.xlu0 %v1503_v29 }
 0x856   : > { %v1505_v30 = vpop.xlane.xlu0 %1504 }
 0x857   : > { %v1506_v31 = vsub.f32 %v1499_v27, %v1505_v30 }
 0x859   : > { %v1507_v33 = vmul.f32 1.442695, %v1506_v31 }
 0x85b   : > { %2128 = vpow2.f32 %v1507_v33 }
 0x865   : > { %v2129_v34 = vpop.eup %2128 }
 0x866   : > { %v1509_v35 = vsel %vm713_vm2, %v2129_v34, 0.0 }
 0x867   : > { %1510 = vadd.xlane.f32.xlu1 %v1509_v35 }
 0x878   : > { %1514 = vrot.lane.b32.xlu1 %v2715_v32, %s2364_s25  ;;  %v1864_v32 = vld [vmem:[%s2847_s8] ss:$0 sm:$0xff] }
 0x897   : > { %v1420_v37 = vpop.f32.mrb[10].mxu0 }
 0x898   : > { %v1424_v1 = vadd.f32 %v1420_v37, %v1183_v8  ;;  %v1987_v38 = vpop.f32.mrb[11].mxu0 }
 0x8f4   : > { %v1511_v39 = vpop.xlane.xlu1 %1510 }
 0x8f5   : > { %2130 = vrcp.f32 %v1511_v39 }
 0x8f8   : > { %v1515_v40 = vpop.permute.xlu1 %1514 }
 0x8f9   : > { %1994 = vmatpush3.msra.mxu0 %v1515_v40 }
 0x8ff   : > { %v2131_v41 = vpop.eup %2130 }
 0x900   : > { %v1513_v42 = vmul.f32 %v2131_v41, %v2129_v34 }
 0x902   : > { %1996 = vmatmul.mubr.msk.f32.vlgmr.msra.gmra.mrb[12].mxu0 %vm713_vm2, %v1513_v42 }
 0x9d5   : > { %v1586_v43 = vpop.f32.mrb[12].mxu0 }
 0x9d6   : > { %v1997_v44 = vpop.f32.mrb[13].mxu0  ;;  %2001 = vmatmul.mubr.msk.f32.vlgmr.msra.gmra.mrb[14].mxu1 %vm713_vm2, %v1586_v43 }
 0xaa9   : > { %v1659_v45 = vpop.f32.mrb[14].mxu1 }
 0xaaa   : > { %v1663_v46 = vadd.f32 %v1659_v45, %v1424_v1  ;;  %v2002_v47 = vpop.f32.mrb[15].mxu1 }
 0xaac   : > { %v1671_v48 = vadd.f32 %v1864_v32, %v1663_v46 }
 0xaae   : > { %v1672_v49 = vadd.f32 %v1671_v48, %v2679_v14  ;;  %v1865_v14 = vld [vmem:[%s2876_s30] ss:$0 sm:$0xff]  ;;  %s2282_s30 = scalar_lea.vmem %s2281_s26, 256 }
 0xaaf   : > { %p2284_p3 = scmp.lt.s32.totalorder %s2282_s30, %s2276_s24 }
 0xab0   : > { %v1673_v50 = vsel %vm472_vm1, %v1672_v49, 0.0 }
 0xab1   : > { %1674 = vadd.xlane.f32.xlu1 %v1673_v50  ;;  %p2285_p13 = por %p2284_p3, %p2283_p12 }
 0xab3   : > { %p2286_p0 = pnand %p2285_p13, %p2279_p9 }
 0xb3e   : > { %v1675_v51 = vpop.xlane.xlu1 %1674 }
 0xb3f   : > { %v1677_v52 = vmul.f32 0.03125, %v1675_v51 }
 0xb41   : > { %v1678_v53 = vsub.f32 %v1672_v49, %v1677_v52 }
 0xb43   : > { %v1679_v54 = vmul.f32 %v1678_v53, %v1678_v53 }
 0xb45   : > { %v1680_v55 = vsel %vm472_vm1, %v1679_v54, 0.0 }
 0xb46   : > { %1681 = vadd.xlane.f32.xlu0 %v1680_v55 }
 0xbd3   : > { %v1682_v56 = vpop.xlane.xlu0 %1681 }
 0xbd4   : > { %v1683_v57 = vmul.f32 0.03125, %v1682_v56 }
 0xbd6   : > { %v1684_v58 = vadd.f32 1e-05, %v1683_v57 }
 0xbd8   : > { %2132 = vrsqrt.f32 %v1684_v58 }
 0xbe2   : > { %v2133_v59 = vpop.eup %2132 }
 0xbe3   : > { %v1686_v60 = vmul.f32 %v2133_v59, %v1678_v53 }
 0xbe5   : > { %v1694_v62 = vmul.f32 %v1865_v14, %v1686_v60 }
 0xbe7   : > { %v1702_v63 = vadd.f32 %v1866_v61, %v1694_v62 }
 0xbe9   : > { %1703 = vst.msk [vmem:[%s459_s12] sm:$0xff] %vm472_vm1, %v1702_v63 }
 0xbea   : > { %2289 = shalt.err (!%p2286_p0)
}
 0xbeb   : > { %s2290_s1 = scalar_lea.hbm %s2794_s0, 128  ;;  %s2294_s10 = scalar_lea.hbm %s2878_s15, 256 }
 0xbec   : > { %p2291_p2 = scmp.ne.s32.totalorder %s2794_s0, %s2290_s1  ;;  %p2295_p10 = scmp.lt.u32.totalorder %s2794_s0, %s2878_s15 }
 0xbed   : > { %p2296_p11 = scmp.lt.u32.totalorder %s2294_s10, %s2290_s1  ;;  %p2298_p6 = scmp.lt.u32.totalorder %s2290_s1, %s2794_s0 }
 0xbee   : > { %p2292_p8 = pnand %p2291_p2, %p2879_p5 }
 0xbef   : > { %p2297_p1 = por %p2296_p11, %p2295_p10 }
 0xbf0   : > { %p2293_p4 = pneg %p2292_p8 }
 0xbf1   : > { %p2299_p7 = por %p2298_p6, %p2297_p1 }
 0xbf3   : > { %p2300_p9 = pnand %p2299_p7, %p2293_p4 }
 0xbf5   : > { %2303 = shalt.err (!%p2300_p9)
}
 0xbf6   : > { %2039 = dma.vmem_to_hbm [thread:$0]  (%p2879_p5), %s2796_s9, 128, %s2794_s0, %s1705_s29  }
 0xbf7 PF: > { %s1730_s25 = sand.u32 1, %s2338_s17   ;;  %p2880_p12 = scmp.ne.s32.totalorder %s2868_s21, 0 }
 0xbf8   : > { %p2881_p3 = scmp.ge.s32.totalorder %s2350_s20, 2  ;;  %s1731_s28 = scalar_lea.sflag [#allocation4], %s1730_s25 }
 0xbfa   : > { %p2059_p13 = pnand %p2881_p3, %p2880_p12 }
 0xbfc   : > { %2333 = dma.done.wait (!%p2059_p13), %s1731_s28, 128  }
 0xbfd   : > { %2335 = vsyncadd (!%p2059_p13), %s1731_s28, 4294967168  ;;  %p26_p0 = scmp.ge.s32.totalorder %s2578_s16, 4   ;;  %s2882_s17 = smov %s2342_s18 }
 0xbfe   : > { %s2883_s18 = smov %s2346_s19  ;;  %s2884_s19 = smov %s2589_s14 }
 0xbff   : > { %s2885_s20 = smov %s2578_s16  ;;  %28 = sbr.rel (!%p26_p0) target bundleno = 13 (0xd), region = 125 }
 0xc06   :  { %1736 = vsyncpa [#allocation3], 1 }
 0xc07   :  { %1738 = vsyncpa [#allocation3 + $0x1], 1 }
 0xc08   :  { %1739 = vsyncpa [#allocation6], 1 }
 0xc09   :  { %1740 = vsyncpa [#allocation9], 1 }
 0xc0a   :  { %1741 = vsyncpa [#allocation4], 1 }
 0xc0b   :  { %1743 = vsyncpa [#allocation4 + $0x1], 1 }

</bundles_post_ra>
